<compile_context>
chip_gen: v7x
topology: tpu7x:2x2x1
jax: 0.10.0
libtpu: 0.0.40
codegen_flags: <defaults>
</compile_context>

<pallas_src>
import functools

import jax
import jax.numpy as jnp
from jax.experimental import pallas as pl
from jax.experimental.pallas import tpu as pltpu

_LANE = 512          # lane width: multiple of 128 -> unmasked vector stores
_TARGET_ROWS = 512   # 512 x 512 f32 block ~= 1 MiB; multiple of 8/16/32 sublanes


def _round_up(n, m):
    return ((n + m - 1) // m) * m


def _mix32(x):
    """lowbias32-style avalanche mix on uint32 values (vector or scalar)."""
    x = x ^ (x >> 16)
    x = x * jnp.uint32(0x7FEB352D)
    x = x ^ (x >> 15)
    x = x * jnp.uint32(0x846CA68B)
    x = x ^ (x >> 16)
    return x


def _gaussian_noise_kernel(seed_ref, x_ref, o_ref, *, std):
    """o = x + std * N(0,1), noise generated from a counter-based hash."""
    tr, lanes = x_ref.shape
    half = lanes // 2

    # Avalanche the seed so calls with nearby seeds produce unrelated streams.
    seed_u = seed_ref[0].astype(jnp.uint32)
    k = _mix32(seed_u * jnp.uint32(0x9E3779B1) + jnp.uint32(0x85EBCA6B))

    # Globally unique counter per (row, lane-pair) element.
    pid = pl.program_id(0)
    row = (jax.lax.broadcasted_iota(jnp.int32, (tr, half), 0)
           + pid * tr).astype(jnp.uint32)
    col = jax.lax.broadcasted_iota(jnp.int32, (tr, half), 1).astype(jnp.uint32)
    idx = row * jnp.uint32(half) + col

    # Two independent 32-bit streams per pair.
    b1 = _mix32(idx * jnp.uint32(0x9E3779B9) + k)
    b2 = _mix32(idx * jnp.uint32(0x85EBCA77) + (k ^ jnp.uint32(0x6A09E667)))

    # 23-bit uniforms in (0, 1]: the +1 avoids log(0) without a clamp.
    inv = jnp.float32(1.0 / (1 << 23))
    u1 = ((b1 >> 9).astype(jnp.int32).astype(jnp.float32) + 1.0) * inv
    u2 = ((b2 >> 9).astype(jnp.int32).astype(jnp.float32) + 1.0) * inv

    # Box-Muller, using BOTH outputs (cos for the first lane-half, sin for the
    # second) to halve the PRNG / log / sqrt work per element.
    r = jnp.sqrt(-2.0 * jnp.log(u1)) * jnp.float32(std)
    theta = jnp.float32(2.0 * jnp.pi) * u2
    z = jnp.concatenate([r * jnp.cos(theta), r * jnp.sin(theta)], axis=1)

    o_ref[...] = (x_ref[...].astype(jnp.float32) + z).astype(o_ref.dtype)


def gaussian_noise(x, std, seed, training=True):
    """Pallas implementation of GaussianNoise.forward.

    x: any-shaped float array (NCHW in the original module).
    std: python float.  seed: python int.  training: eval mode is identity.
    """
    if not training or std == 0.0:
        return x

    orig_shape = x.shape
    dtype = x.dtype
    total = int(x.size)

    # Flatten to a lane-dense (rows, 512) view.
    rows = _round_up(total, _LANE) // _LANE
    if rows <= _TARGET_ROWS:
        tr = rows                      # single row-block: full-extent dims OK
    else:
        tr = _TARGET_ROWS              # multiple of 8 (f32) / 16 (bf16) / 32 (i8)
        rows = _round_up(rows, tr)
    padded_total = rows * _LANE

    x_flat = x.reshape(-1)
    if padded_total != total:
        x_flat = jnp.pad(x_flat, (0, padded_total - total))
    x2 = x_flat.reshape(rows, _LANE)

    grid = (rows // tr,)
    seed_arr = jnp.asarray([seed], dtype=jnp.int32)

    itemsize = jnp.dtype(dtype).itemsize
    out2 = pl.pallas_call(
        functools.partial(_gaussian_noise_kernel, std=float(std)),
        out_shape=jax.ShapeDtypeStruct((rows, _LANE), dtype),
        grid=grid,
        in_specs=[
            pl.BlockSpec(memory_space=pltpu.MemorySpace.SMEM),   # seed scalar
            pl.BlockSpec((tr, _LANE), lambda i: (i, 0)),         # x tile
        ],
        out_specs=pl.BlockSpec((tr, _LANE), lambda i: (i, 0)),
        compiler_params=pltpu.CompilerParams(
            dimension_semantics=("parallel",),      # tiles are independent
            vmem_limit_bytes=32 * 1024 * 1024,
        ),
        cost_estimate=pl.CostEstimate(
            flops=12 * padded_total,
            transcendentals=2 * padded_total,
            bytes_accessed=2 * padded_total * itemsize,
        ),
    )(seed_arr, x2)

    out_flat = out2.reshape(-1)
    if padded_total != total:
        out_flat = out_flat[:total]
    return out_flat.reshape(orig_shape)


if __name__ == "__main__":
    key = jax.random.PRNGKey(0)
    x = jax.random.normal(key, (2, 4, 16, 16), dtype=jnp.float32)

    std = 0.1
    y = jax.block_until_ready(gaussian_noise(x, std=std, seed=1234, training=True))

    # Shape / dtype preserved; noise has roughly the requested scale.
    assert y.shape == x.shape and y.dtype == x.dtype
    noise = y - x
    noise_std = float(jnp.std(noise))
    noise_mean = float(jnp.mean(noise))
    assert 0.05 < noise_std < 0.2, f"unexpected noise std {noise_std}"
    assert abs(noise_mean) < 0.05, f"unexpected noise mean {noise_mean}"

    # Determinism: same seed -> same output, different seed -> different noise.
    y2 = jax.block_until_ready(gaussian_noise(x, std=std, seed=1234, training=True))
    assert bool(jnp.all(y == y2))
    y3 = jax.block_until_ready(gaussian_noise(x, std=std, seed=4321, training=True))
    assert not bool(jnp.all(y == y3))

    # Non-multiple-of-128 spatial size exercises the padding path.
    x_odd = jax.random.normal(key, (2, 3, 7, 7), dtype=jnp.float32)
    y_odd = jax.block_until_ready(gaussian_noise(x_odd, std=std, seed=7, training=True))
    assert y_odd.shape == x_odd.shape
    odd_std = float(jnp.std(y_odd - x_odd))
    assert 0.03 < odd_std < 0.3, f"unexpected odd noise std {odd_std}"

    # Eval mode: identity.
    y_eval = gaussian_noise(x, std=std, seed=1234, training=False)
    assert bool(jnp.all(y_eval == x))

    print("KERNEL_OK")
</pallas_src>

<mosaic_0001>
module attributes {stable_mosaic.version = 11 : i64} {
  func.func @_gaussian_noise_kernel(%arg0: i32, %arg1: memref<1xi32, #tpu.memory_space<smem>>, %arg2: memref<4x512xf32, #tpu.memory_space<vmem>>, %arg3: memref<4x512xf32, #tpu.memory_space<vmem>>) attributes {dimension_semantics = [#tpu.dimension_semantics<parallel>], iteration_bounds = array<i64: 1>, scalar_prefetch = 0 : i64, scratch_operands = 0 : i64, tpu.core_type = #tpu.core_type<tc>, window_params = [{transform_indices = @transform_0, window_bounds = array<i64: 1>}, {transform_indices = @transform_1, window_bounds = array<i64: 4, 512>}, {transform_indices = @transform_2, window_bounds = array<i64: 4, 512>}]} {
    %c0 = arith.constant 0 : index
    %0 = memref.load %arg1[%c0] : memref<1xi32, #tpu.memory_space<smem>>
    %c-1640531535_i32 = arith.constant -1640531535 : i32
    %1 = arith.muli %0, %c-1640531535_i32 : i32
    %c-2048144789_i32 = arith.constant -2048144789 : i32
    %2 = arith.addi %1, %c-2048144789_i32 : i32
    %c16_i32 = arith.constant 16 : i32
    %3 = arith.shrui %2, %c16_i32 : i32
    %4 = arith.xori %2, %3 : i32
    %c2146121005_i32 = arith.constant 2146121005 : i32
    %5 = arith.muli %4, %c2146121005_i32 : i32
    %c15_i32 = arith.constant 15 : i32
    %6 = arith.shrui %5, %c15_i32 : i32
    %7 = arith.xori %5, %6 : i32
    %c-2073254261_i32 = arith.constant -2073254261 : i32
    %8 = arith.muli %7, %c-2073254261_i32 : i32
    %c16_i32_0 = arith.constant 16 : i32
    %9 = arith.shrui %8, %c16_i32_0 : i32
    %10 = arith.xori %8, %9 : i32
    %11 = tpu.iota {dimensions = array<i32: 0>} : vector<4x256xi32>
    %c4_i32 = arith.constant 4 : i32
    %12 = arith.muli %arg0, %c4_i32 : i32
    %13 = vector.broadcast %12 : i32 to vector<4x256xi32>
    %14 = arith.addi %11, %13 : vector<4x256xi32>
    %15 = tpu.iota {dimensions = array<i32: 1>} : vector<4x256xi32>
    %c256_i32 = arith.constant 256 : i32
    %16 = vector.broadcast %c256_i32 : i32 to vector<4x256xi32>
    %17 = arith.muli %14, %16 : vector<4x256xi32>
    %18 = arith.addi %17, %15 : vector<4x256xi32>
    %c-1640531527_i32 = arith.constant -1640531527 : i32
    %19 = vector.broadcast %c-1640531527_i32 : i32 to vector<4x256xi32>
    %20 = arith.muli %18, %19 : vector<4x256xi32>
    %21 = vector.broadcast %10 : i32 to vector<4x256xi32>
    %22 = arith.addi %20, %21 : vector<4x256xi32>
    %c16_i32_1 = arith.constant 16 : i32
    %23 = vector.broadcast %c16_i32_1 : i32 to vector<4x256xi32>
    %24 = arith.shrui %22, %23 : vector<4x256xi32>
    %25 = arith.xori %22, %24 : vector<4x256xi32>
    %c2146121005_i32_2 = arith.constant 2146121005 : i32
    %26 = vector.broadcast %c2146121005_i32_2 : i32 to vector<4x256xi32>
    %27 = arith.muli %25, %26 : vector<4x256xi32>
    %c15_i32_3 = arith.constant 15 : i32
    %28 = vector.broadcast %c15_i32_3 : i32 to vector<4x256xi32>
    %29 = arith.shrui %27, %28 : vector<4x256xi32>
    %30 = arith.xori %27, %29 : vector<4x256xi32>
    %c-2073254261_i32_4 = arith.constant -2073254261 : i32
    %31 = vector.broadcast %c-2073254261_i32_4 : i32 to vector<4x256xi32>
    %32 = arith.muli %30, %31 : vector<4x256xi32>
    %c16_i32_5 = arith.constant 16 : i32
    %33 = vector.broadcast %c16_i32_5 : i32 to vector<4x256xi32>
    %34 = arith.shrui %32, %33 : vector<4x256xi32>
    %35 = arith.xori %32, %34 : vector<4x256xi32>
    %c-2048144777_i32 = arith.constant -2048144777 : i32
    %36 = vector.broadcast %c-2048144777_i32 : i32 to vector<4x256xi32>
    %37 = arith.muli %18, %36 : vector<4x256xi32>
    %c1779033703_i32 = arith.constant 1779033703 : i32
    %38 = arith.xori %10, %c1779033703_i32 : i32
    %39 = vector.broadcast %38 : i32 to vector<4x256xi32>
    %40 = arith.addi %37, %39 : vector<4x256xi32>
    %c16_i32_6 = arith.constant 16 : i32
    %41 = vector.broadcast %c16_i32_6 : i32 to vector<4x256xi32>
    %42 = arith.shrui %40, %41 : vector<4x256xi32>
    %43 = arith.xori %40, %42 : vector<4x256xi32>
    %c2146121005_i32_7 = arith.constant 2146121005 : i32
    %44 = vector.broadcast %c2146121005_i32_7 : i32 to vector<4x256xi32>
    %45 = arith.muli %43, %44 : vector<4x256xi32>
    %c15_i32_8 = arith.constant 15 : i32
    %46 = vector.broadcast %c15_i32_8 : i32 to vector<4x256xi32>
    %47 = arith.shrui %45, %46 : vector<4x256xi32>
    %48 = arith.xori %45, %47 : vector<4x256xi32>
    %c-2073254261_i32_9 = arith.constant -2073254261 : i32
    %49 = vector.broadcast %c-2073254261_i32_9 : i32 to vector<4x256xi32>
    %50 = arith.muli %48, %49 : vector<4x256xi32>
    %c16_i32_10 = arith.constant 16 : i32
    %51 = vector.broadcast %c16_i32_10 : i32 to vector<4x256xi32>
    %52 = arith.shrui %50, %51 : vector<4x256xi32>
    %53 = arith.xori %50, %52 : vector<4x256xi32>
    %c9_i32 = arith.constant 9 : i32
    %54 = vector.broadcast %c9_i32 : i32 to vector<4x256xi32>
    %55 = arith.shrui %35, %54 : vector<4x256xi32>
    %56 = arith.sitofp %55 : vector<4x256xi32> to vector<4x256xf32>
    %cst = arith.constant 1.000000e+00 : f32
    %57 = vector.broadcast %cst : f32 to vector<4x256xf32>
    %58 = arith.addf %56, %57 : vector<4x256xf32>
    %cst_11 = arith.constant 1.1920929E-7 : f32
    %59 = vector.broadcast %cst_11 : f32 to vector<4x256xf32>
    %60 = arith.mulf %58, %59 : vector<4x256xf32>
    %c9_i32_12 = arith.constant 9 : i32
    %61 = vector.broadcast %c9_i32_12 : i32 to vector<4x256xi32>
    %62 = arith.shrui %53, %61 : vector<4x256xi32>
    %63 = arith.sitofp %62 : vector<4x256xi32> to vector<4x256xf32>
    %cst_13 = arith.constant 1.000000e+00 : f32
    %64 = vector.broadcast %cst_13 : f32 to vector<4x256xf32>
    %65 = arith.addf %63, %64 : vector<4x256xf32>
    %cst_14 = arith.constant 1.1920929E-7 : f32
    %66 = vector.broadcast %cst_14 : f32 to vector<4x256xf32>
    %67 = arith.mulf %65, %66 : vector<4x256xf32>
    %68 = math.log %60 : vector<4x256xf32>
    %cst_15 = arith.constant -2.000000e+00 : f32
    %69 = vector.broadcast %cst_15 : f32 to vector<4x256xf32>
    %70 = arith.mulf %69, %68 : vector<4x256xf32>
    %71 = math.sqrt %70 : vector<4x256xf32>
    %cst_16 = arith.constant 1.000000e-01 : f32
    %72 = vector.broadcast %cst_16 : f32 to vector<4x256xf32>
    %73 = arith.mulf %71, %72 : vector<4x256xf32>
    %cst_17 = arith.constant 6.28318548 : f32
    %74 = vector.broadcast %cst_17 : f32 to vector<4x256xf32>
    %75 = arith.mulf %74, %67 : vector<4x256xf32>
    %76 = math.cos %75 : vector<4x256xf32>
    %77 = arith.mulf %73, %76 : vector<4x256xf32>
    %78 = math.sin %75 : vector<4x256xf32>
    %79 = arith.mulf %73, %78 : vector<4x256xf32>
    %80 = tpu.concatenate %77, %79 in 1 : vector<4x256xf32>, vector<4x256xf32> -> vector<4x512xf32>
    %c0_18 = arith.constant 0 : index
    %c0_19 = arith.constant 0 : index
    %81 = vector.load %arg2[%c0_18, %c0_19] : memref<4x512xf32, #tpu.memory_space<vmem>>, vector<4x512xf32>
    %82 = arith.addf %81, %80 : vector<4x512xf32>
    %c0_20 = arith.constant 0 : index
    %c0_21 = arith.constant 0 : index
    %83 = vector.load %arg3[%c0_20, %c0_21] : memref<4x512xf32, #tpu.memory_space<vmem>>, vector<4x512xf32>
    tpu.vector_store %arg3[%c0_20, %c0_21], %82 {strides = array<i32>} : memref<4x512xf32, #tpu.memory_space<vmem>>, vector<4x512xf32>,
    return
  }
  func.func @transform_0(%arg0: i32) -> i32 {
    %c0_i32 = arith.constant 0 : i32
    %c0_i32_0 = arith.constant 0 : i32
    return %c0_i32 : i32
  }
  func.func @transform_1(%arg0: i32) -> (i32, i32) {
    %c0_i32 = arith.constant 0 : i32
    %c0_i32_0 = arith.constant 0 : i32
    return %arg0, %c0_i32 : i32, i32
  }
  func.func @transform_2(%arg0: i32) -> (i32, i32) {
    %c0_i32 = arith.constant 0 : i32
    %c0_i32_0 = arith.constant 0 : i32
    return %arg0, %c0_i32 : i32, i32
  }
}

</mosaic_0001>

<bundles_post_ra>
// kernel: tpu_custom_call.1
= control target key start
LH: loop header
LB: loop body
LE: loop exit
PB: predicated region body
PF: predicated region fallthrough
CT: control target
= control target key end

     0   :  { %8 = vsyncpa [#allocation4], 0  ;;  %s822_s0 = inlined_call_operand.<no memory space> [shape: s32[1], index: 0, kind: input, shape index: {}]   ;;  %s823_s1 = inlined_call_operand.hbm [shape: f32[4,512], index: 1, kind: input, shape index: {}]   ;;  %s824_s2 = inlined_call_operand.hbm [shape: f32[4,512], index: 2, kind: output, shape index: {}]  }
   0x1   :  { %9 = vsyncpa [#allocation5], 0  ;;  %s673_s9 = smov [#allocation3]   ;;  %s625_s13 = scalar_lea.hbm %s823_s1, 256 }
   0x2   :  { %s18_s10 = sshll.u32 %s673_s9, 4  ;;  %p626_p0 = scmp.ne.s32.totalorder %s823_s1, %s625_s13  ;;  %s19_s10 = int_to_ptr.vmem [resolvable:$true] %s18_s10 }
   0x3   :  { %p629_p1 = scmp.lt.u32.totalorder %s625_s13, %s823_s1 }
   0x5   :  { %p631_p2 = pnand %p629_p1, %p626_p0 }
   0x7   :  { %634 = shalt.err (!%p631_p2)
}
   0x8   :  { %s635_s18 = scalar_lea.vmem %s19_s10, 256  ;;  %p640_p4 = scmp.lt.s32.totalorder %s19_s10, %s19_s10 }
   0x9   :  { %p636_p3 = scmp.ne.s32.totalorder %s19_s10, %s635_s18  ;;  %p641_p5 = scmp.lt.s32.totalorder %s635_s18, %s635_s18 }
   0xb   :  { %p642_p6 = por %p641_p5, %p640_p4 }
   0xd   :  { %p643_p7 = pnand %p642_p6, %p636_p3 }
   0xf   :  { %646 = shalt.err (!%p643_p7)
}
  0x10   :  { %21 = dma.hbm_to_vmem [thread:$0]  %s823_s1, 256, %s19_s10, [#allocation4]  }
  0x11   :  { %669 = dma.done.wait [#allocation4], 256  }
  0x12   :  { %670 = vsyncadd [#allocation4], 4294967040  ;;  %s26_s23 = smul.u32 2654435761, %s822_s0  ;;  %v36_v0 = vlaneseq  ;;  %s680_s0 = smov [#allocation6]  }
  0x13   :  { %s568_s5 = sshll.u32 %s680_s0, 4  ;;  %s569_s5 = int_to_ptr.vmem [resolvable:$true] %s568_s5 }
  0x14   :  { %s27_s24 = sadd.s32 2246822507, %s26_s23  ;;  %v37_v1 = vshrl.u32 %v36_v0, 7  ;;  %v42_v2 = vand.u32 127, %v36_v0  ;;  %s647_s6 = scalar_lea.vmem %s569_s5, 256 }
  0x15   :  { %s28_s25 = sshrl.u32 %s27_s24, 16  ;;  %p648_p8 = scmp.ne.s32.totalorder %s569_s5, %s647_s6 }
  0x16   :  { %s29_s26 = sxor.u32 %s28_s25, %s27_s24  ;;  %v43_v3 = vadd.s32 128, %v42_v2  ;;  %v44_v4 = vmul.u32 256, %v37_v1  ;;  %p652_p9 = scmp.lt.s32.totalorder %s569_s5, %s569_s5 }
  0x17   :  { %s30_s27 = smul.u32 2146121005, %s29_s26  ;;  %p653_p10 = scmp.lt.s32.totalorder %s647_s6, %s647_s6 }
  0x18   :  { %v45_v5 = vadd.s32 %v44_v4, %v42_v2  ;;  %v46_v6 = vadd.s32 %v44_v4, %v43_v3 }
  0x19   :  { %s31_s28 = sshrl.u32 %s30_s27, 15  ;;  %p654_p11 = por %p653_p10, %p652_p9 }
  0x1a   :  { %s32_s29 = sxor.u32 %s31_s28, %s30_s27  ;;  %v68_v7 = vmul.u32 2246822519, %v45_v5  ;;  %v69_v8 = vmul.u32 2246822519, %v46_v6 }
  0x1b   :  { %s33_s1 = smul.u32 2221713035, %s32_s29  ;;  %v47_v16 = vmul.u32 2654435769, %v45_v5  ;;  %v48_v22 = vmul.u32 2654435769, %v46_v6  ;;  %p655_p12 = pnand %p654_p11, %p648_p8 }
  0x1d   :  { %s34_s30 = sshrl.u32 %s33_s1, 16 }
  0x1e   :  { %s35_s3 = sxor.u32 %s34_s30, %s33_s1 }
  0x1f   :  { %s70_s4 = sxor.u32 1779033703, %s35_s3  ;;  %v49_v17 = vstv %s35_s3 }
  0x20   :  { %v71_v9 = vstv %s70_s4  ;;  %v50_v23 = vadd.s32 %v49_v17, %v47_v16  ;;  %v51_v28 = vadd.s32 %v49_v17, %v48_v22  ;;  %v677_v17 = vmov 2102212464  }
  0x21   :  { %v72_v10 = vadd.s32 %v71_v9, %v68_v7  ;;  %v73_v11 = vadd.s32 %v71_v9, %v69_v8 }
  0x22   :  { %v52_v29 = vshrl.u32 %v50_v23, 16  ;;  %v53_v34 = vshrl.u32 %v51_v28, 16 }
  0x23   :  { %v74_v12 = vshrl.u32 %v72_v10, 16  ;;  %v75_v13 = vshrl.u32 %v73_v11, 16 }
  0x24   :  { %v54_v35 = vxor.u32 %v52_v29, %v50_v23  ;;  %v55_v40 = vxor.u32 %v53_v34, %v51_v28  ;;  %v679_v29 = vmov 1326507024  }
  0x25   :  { %v76_v14 = vxor.u32 %v74_v12, %v72_v10  ;;  %v77_v15 = vxor.u32 %v75_v13, %v73_v11  ;;  %v674_v11 = vmov 683565275   ;;  %v675_v13 = vmov 2475754826  }
  0x26   :  { %v56_v41 = vmul.u32 2146121005, %v54_v35  ;;  %v57_v46 = vmul.u32 2146121005, %v55_v40 }
  0x27   :  { %v78_v18 = vmul.u32 2146121005, %v76_v14  ;;  %v79_v19 = vmul.u32 2146121005, %v77_v15  ;;  %v676_v15 = vmov 2131351028  }
  0x28   :  { %v58_v47 = vshrl.u32 %v56_v41, 15  ;;  %v59_v51 = vshrl.u32 %v57_v46, 15 }
  0x29   :  { %v80_v20 = vshrl.u32 %v78_v18, 15  ;;  %v81_v21 = vshrl.u32 %v79_v19, 15 }
  0x2a   :  { %v60_v52 = vxor.u32 %v58_v47, %v56_v41  ;;  %v61_v58 = vxor.u32 %v59_v51, %v57_v46 }
  0x2b   :  { %v82_v24 = vxor.u32 %v80_v20, %v78_v18  ;;  %v83_v25 = vxor.u32 %v81_v21, %v79_v19  ;;  %v678_v19 = vmov 920167782  }
  0x2c   :  { %v62_v59 = vmul.u32 2221713035, %v60_v52  ;;  %v63_v0 = vmul.u32 2221713035, %v61_v58 }
  0x2d   :  { %v84_v26 = vmul.u32 2221713035, %v82_v24  ;;  %v85_v27 = vmul.u32 2221713035, %v83_v25 }
  0x2e   :  { %v64_v1 = vshrl.u32 %v62_v59, 16  ;;  %v65_v6 = vshrl.u32 %v63_v0, 16 }
  0x2f   :  { %v86_v30 = vshrl.u32 %v84_v26, 16  ;;  %v87_v31 = vshrl.u32 %v85_v27, 16 }
  0x30   :  { %v721_v7 = vxor.u32 %v64_v1, %v62_v59 }
  0x31   :  { %v88_v32 = vxor.u32 %v86_v30, %v84_v26  ;;  %v89_v33 = vxor.u32 %v87_v31, %v85_v27 }
  0x33   :  { %v98_v36 = vshrl.u32 %v88_v32, 9  ;;  %v99_v37 = vshrl.u32 %v89_v33, 9 }
  0x35   :  { %v100_v38 = vcvt.s32.f32 %v98_v36  ;;  %v101_v39 = vcvt.s32.f32 %v99_v37 }
  0x37   :  { %v102_v42 = vadd.f32 1.0, %v100_v38  ;;  %v103_v43 = vadd.f32 1.0, %v101_v39 }
  0x39   :  { %v104_v44 = vmul.f32 1.1920929e-07, %v102_v42  ;;  %v105_v45 = vmul.f32 1.1920929e-07, %v103_v43 }
  0x3b   :  { %v711_v48 = vmul.f32 6.2831855, %v104_v44  ;;  %v713_v49 = vmul.f32 6.2831855, %v105_v45  ;;  %v67_v44 = vxor.u32 %v65_v6, %v63_v0 }
  0x3d   :  { %v133_v50 = vand.u32 2139095040, %v711_v48  ;;  %v236_v53 = vand.u32 2139095040, %v713_v49  ;;  %v130_v55 = vand.u32 2147483647, %v711_v48  ;;  %v233_v5 = vand.u32 2147483647, %v713_v49 }
  0x3e   :  { %vm132_vm13 = vcmp.lt.s32.totalorder %v711_v48, 0 }
  0x3f   :  { %v134_v54 = vshrl.u32 %v133_v50, 23  ;;  %v237_v56 = vshrl.u32 %v236_v53, 23  ;;  %v137_v62 = vand.u32 8388607, %v130_v55  ;;  %v240_v22 = vand.u32 8388607, %v233_v5 }
  0x40   :  { %vm777_vm15 = vcmp.le.f32.partialorder %v130_v55, 0.7853982 }
  0x41   :  { %v577_v57 = vadd.s32 4294967169, %v134_v54  ;;  %v581_v60 = vadd.s32 4294967169, %v237_v56  ;;  %v138_v4 = vor.u32 8388608, %v137_v62  ;;  %v241_v47 = vor.u32 8388608, %v240_v22 }
  0x42   :  { %v90_v62 = vshrl.u32 %v721_v7, 9 }
  0x43   :  { %v140_v61 = vadd.s32 1, %v577_v57  ;;  %v243_v63 = vadd.s32 1, %v581_v60  ;;  %v724_v21 = vshll.u32 %v138_v4, 8  ;;  %v281_v6 = vshll.u32 %v241_v47, 8 }
  0x45   :  { %vm141_vm0 = vcmp.gt.s32.totalorder %v140_v61, 0  ;;  %vm244_vm1 = vcmp.gt.s32.totalorder %v243_v63, 0 }
  0x46   :  { %v142_v2 = vsel %vm141_vm0, %v140_v61, 0  ;;  %v245_v9 = vsel %vm244_vm1, %v243_v63, 0  ;;  %vm235_vm0 = vcmp.lt.s32.totalorder %v713_v49, 0  ;;  %vm234_vm1 = vcmp.le.f32.partialorder %v233_v5, 0.7853982 }
  0x47   :  { %v144_v3 = vand.u32 31, %v142_v2  ;;  %v143_v8 = vshrl.u32 %v142_v2, 5  ;;  %v247_v26 = vand.u32 31, %v245_v9  ;;  %v246_v63 = vshrl.u32 %v245_v9, 5 }
  0x48   :  { %v91_v2 = vshrl.u32 %v67_v44, 9 }
  0x49   :  { %v145_v10 = vsub.s32 32, %v144_v3  ;;  %v147_v12 = vshll.u32 %v674_v11, %v144_v3  ;;  %v150_v14 = vshll.u32 %v675_v13, %v144_v3  ;;  %v153_v16 = vshll.u32 %v676_v15, %v144_v3 }
  0x4a   :  { %v156_v18 = vshll.u32 %v677_v17, %v144_v3  ;;  %v159_v20 = vshll.u32 %v678_v19, %v144_v3  ;;  %vm162_vm2 = vcmp.lt.s32.totalorder %v143_v8, 1  ;;  %vm165_vm3 = vcmp.lt.s32.totalorder %v143_v8, 4 }
  0x4b   :  { %v148_v23 = vshrl.u32 %v675_v13, %v145_v10  ;;  %v151_v24 = vshrl.u32 %v676_v15, %v145_v10  ;;  %v154_v25 = vshrl.u32 %v677_v17, %v145_v10  ;;  %v146_v27 = vshrl.u32 %v674_v11, %v145_v10 }
  0x4c   :  { %v157_v28 = vshrl.u32 %v678_v19, %v145_v10  ;;  %v160_v30 = vshrl.u32 %v679_v29, %v145_v10  ;;  %vm163_vm4 = vcmp.lt.s32.totalorder %v143_v8, 2  ;;  %vm164_vm5 = vcmp.lt.s32.totalorder %v143_v8, 3 }
  0x4d   :  { %v149_v31 = vor.u32 %v148_v23, %v147_v12  ;;  %v152_v32 = vor.u32 %v151_v24, %v150_v14  ;;  %v155_v33 = vor.u32 %v154_v25, %v153_v16  ;;  %v248_v39 = vsub.s32 32, %v247_v26 }
  0x4e   :  { %v158_v34 = vor.u32 %v157_v28, %v156_v18  ;;  %v161_v35 = vor.u32 %v160_v30, %v159_v20  ;;  %v250_v52 = vshll.u32 %v674_v11, %v247_v26  ;;  %v253_v53 = vshll.u32 %v675_v13, %v247_v26 }
  0x4f   :  { %v167_v36 = vsel %vm165_vm3, %v155_v33, 2102212464  ;;  %v170_v37 = vsel %vm162_vm2, %v149_v31, %v152_v32  ;;  %v174_v38 = vsel %vm162_vm2, %v152_v32, %v155_v33  ;;  %v166_v40 = vsel %vm162_vm2, %v146_v27, %v149_v31 }
  0x50   :  { %v168_v41 = vsel %vm164_vm5, %v152_v32, %v167_v36  ;;  %v171_v42 = vsel %vm165_vm3, %v158_v34, 920167782  ;;  %v175_v43 = vsel %vm165_vm3, %v161_v35, 1326507024  ;;  %v251_v58 = vshrl.u32 %v675_v13, %v248_v39 }
  0x51   :  { %v172_v45 = vsel %vm164_vm5, %v155_v33, %v171_v42  ;;  %v176_v46 = vsel %vm164_vm5, %v158_v34, %v175_v43  ;;  %v169_v54 = vsel %vm163_vm4, %v166_v40, %v168_v41  ;;  %v254_v61 = vshrl.u32 %v676_v15, %v248_v39 }
  0x52   :  { %v173_v50 = vsel %vm163_vm4, %v170_v37, %v172_v45  ;;  %v177_v51 = vsel %vm163_vm4, %v174_v38, %v176_v46  ;;  %v256_v0 = vshll.u32 %v676_v15, %v247_v26  ;;  %v257_v1 = vshrl.u32 %v677_v17, %v248_v39 }
  0x53   :  { %v734_v56 = vmul.u32.u64.low %v724_v21, %v177_v51  ;;  %v735_v57 = vmul.u32.u64.high %v724_v21, %v177_v51, %v734_v56  ;;  %v738_v59 = vmul.u32.u64.low %v724_v21, %v173_v50  ;;  %v739_v60 = vmul.u32.u64.high %v724_v21, %v173_v50, %v738_v59 }
  0x54   :  { %v185_v3 = vmul.u32 %v724_v21, %v169_v54  ;;  %v259_v4 = vshll.u32 %v677_v17, %v247_v26  ;;  %v252_v8 = vor.u32 %v251_v58, %v250_v52  ;;  %v255_v10 = vor.u32 %v254_v61, %v253_v53 }
  0x55   :  { %vm187_vm6 = vc.u32 %v735_v57, %v738_v59  ;;  %v258_v12 = vor.u32 %v257_v1, %v256_v0  ;;  %v188_v13 = vadd.s32 1, %v739_v60  ;;  %v260_v14 = vshrl.u32 %v678_v19, %v248_v39 }
  0x56   :  { %v262_v16 = vshll.u32 %v678_v19, %v247_v26  ;;  %v263_v18 = vshrl.u32 %v679_v29, %v248_v39  ;;  %v249_v7 = vshrl.u32 %v674_v11, %v248_v39  ;;  %vm265_vm7 = vcmp.lt.s32.totalorder %v246_v63, 1 }
  0x57   :  { %vm266_vm8 = vcmp.lt.s32.totalorder %v246_v63, 2  ;;  %vm268_vm9 = vcmp.lt.s32.totalorder %v246_v63, 4  ;;  %v189_v9 = vsel %vm187_vm6, %v188_v13, %v739_v60  ;;  %v261_v15 = vor.u32 %v260_v14, %v259_v4 }
  0x58   :  { %v264_v17 = vor.u32 %v263_v18, %v262_v16  ;;  %vm267_vm10 = vcmp.lt.s32.totalorder %v246_v63, 3  ;;  %v190_v20 = vadd.s32 %v189_v9, %v185_v3  ;;  %v270_v21 = vsel %vm268_vm9, %v258_v12, 2102212464 }
  0x59   :  { %v273_v22 = vsel %vm265_vm7, %v252_v8, %v255_v10  ;;  %v277_v23 = vsel %vm265_vm7, %v255_v10, %v258_v12  ;;  %v92_v24 = vcvt.s32.f32 %v90_v62  ;;  %v274_v25 = vsel %vm268_vm9, %v261_v15, 920167782 }
  0x5a   :  { %v278_v19 = vsel %vm268_vm9, %v264_v17, 1326507024  ;;  %v93_v26 = vcvt.s32.f32 %v91_v2  ;;  %v191_v27 = vadd.s32 536870912, %v190_v20  ;;  %v275_v11 = vsel %vm267_vm10, %v258_v12, %v274_v25 }
  0x5b   :  { %v279_v28 = vsel %vm267_vm10, %v261_v15, %v278_v19  ;;  %v269_v29 = vsel %vm265_vm7, %v249_v7, %v252_v8  ;;  %v271_v30 = vsel %vm267_vm10, %v255_v10, %v270_v21  ;;  %v276_v31 = vsel %vm266_vm8, %v273_v22, %v275_v11 }
  0x5c   :  { %v280_v32 = vsel %vm266_vm8, %v277_v23, %v279_v28  ;;  %v754_v33 = vshrl.u32 %v191_v27, 30  ;;  %v759_v36 = vmul.u32.u64.low %v281_v6, %v276_v31  ;;  %v760_v37 = vmul.u32.u64.high %v281_v6, %v276_v31, %v759_v36 }
  0x5d   :  { %v756_v34 = vmul.u32.u64.low %v281_v6, %v280_v32  ;;  %v757_v35 = vmul.u32.u64.high %v281_v6, %v280_v32, %v756_v34  ;;  %v94_v38 = vadd.f32 1.0, %v92_v24  ;;  %v272_v40 = vsel %vm266_vm8, %v269_v29, %v271_v30 }
  0x5e   :  { %v193_v39 = vshll.u32 %v754_v33, 30  ;;  %v95_v41 = vadd.f32 1.0, %v93_v26  ;;  %v288_v43 = vmul.u32 %v281_v6, %v272_v40  ;;  %v291_v44 = vadd.s32 1, %v760_v37 }
  0x5f   :  { %vm290_vm11 = vc.u32 %v757_v35, %v759_v36  ;;  %v96_v45 = vmul.f32 1.1920929e-07, %v94_v38  ;;  %v186_v60 = vadd.s32 %v738_v59, %v735_v57  ;;  %v289_v21 = vadd.s32 %v759_v36, %v757_v35 }
  0x60   :  { %v194_v42 = vsub.s32 %v190_v20, %v193_v39  ;;  %v97_v47 = vmul.f32 1.1920929e-07, %v95_v41  ;;  %v292_v50 = vsel %vm290_vm11, %v291_v44, %v760_v37  ;;  %v216_v28 = vsub.s32 4, %v754_v33 }
  0x61   :  { %v293_v52 = vadd.s32 %v292_v50, %v288_v43  ;;  %609 = vlog2.f32 %v96_v45 }
  0x62   :  { %v196_v46 = vsub.s32 0, %v194_v42  ;;  %611 = vlog2.f32 %v97_v47  ;;  %v217_v34 = vsel %vm132_vm13, %v216_v28, %v754_v33 }
  0x63   :  { %v294_v54 = vadd.s32 536870912, %v293_v52  ;;  %v219_v38 = vsel %vm777_vm15, 0, %v217_v34 }
  0x64   :  { %v578_v51 = vmin.u32 %v196_v46, %v194_v42 }
  0x65   :  { %v295_v58 = vshrl.u32 %v294_v54, 30 }
  0x66   :  { %v198_v53 = vclz %v578_v51  ;;  %v223_v51 = vand.u32 3, %v219_v38 }
  0x67   :  { %v296_v62 = vshll.u32 %v295_v58, 30  ;;  %v319_v37 = vsub.s32 4, %v295_v58 }
  0x68   :  { %v579_v56 = vadd.s32 4294967294, %v198_v53  ;;  %vm225_vm3 = vcmp.eq.s32.totalorder %v223_v51, 0  ;;  %vm228_vm4 = vcmp.eq.s32.totalorder %v223_v51, 2  ;;  %vm224_vm9 = vcmp.lt.s32.totalorder %v223_v51, 2 }
  0x69   :  { %v297_v2 = vsub.s32 %v293_v52, %v296_v62  ;;  %v320_v41 = vsel %vm235_vm0, %v319_v37, %v295_v58 }
  0x6a   :  { %vm580_vm12 = vcmp.lt.s32.totalorder %v579_v56, 0  ;;  %v322_v47 = vsel %vm234_vm1, 0, %v320_v41 }
  0x6b   :  { %v201_v61 = vsel %vm580_vm12, 0, %v579_v56  ;;  %v299_v6 = vsub.s32 0, %v297_v2  ;;  %v610_v8 = vpop.eup %609  ;;  %v535_v56 = vadd.s32 3, %v322_v47  ;;  %vm222_vm12 = vweird.f32 %v711_v48 }
  0x6c   :  { %v202_v63 = vsub.s32 32, %v201_v61  ;;  %v203_v0 = vshll.u32 %v194_v42, %v201_v61  ;;  %v206_v1 = vsub.s32 4294967266, %v201_v61  ;;  %v612_v13 = vpop.eup %611  ;;  %v107_v7 = vmul.f32 0.6931472, %v610_v8 }
  0x6d   :  { %v582_v14 = vmin.u32 %v299_v6, %v297_v2  ;;  %v109_v57 = vmul.f32 0.6931472, %v612_v13  ;;  %v431_v42 = vadd.s32 3, %v219_v38 }
  0x6e   :  { %v204_v3 = vshrl.u32 %v186_v60, %v202_v63  ;;  %v207_v4 = vadd.s32 127, %v206_v1  ;;  %v769_v20 = vmul.f32 -2.0, %v107_v7  ;;  %v536_v1 = vand.u32 3, %v535_v56 }
  0x6f   :  { %v301_v9 = vclz %v582_v14  ;;  %v773_v22 = vmul.f32 -2.0, %v109_v57  ;;  %v432_v53 = vand.u32 3, %v431_v42 }
  0x70   :  { %v205_v10 = vor.u32 %v204_v3, %v203_v0  ;;  %v208_v12 = vshll.u32 %v207_v4, 23  ;;  %613 = vrsqrt.f32 %v769_v20  ;;  %vm114_vm2 = vcmp.eq.f32.partialorder %v769_v20, inf }
  0x71   :  { %v583_v15 = vadd.s32 4294967294, %v301_v9  ;;  %615 = vrsqrt.f32 %v773_v22  ;;  %v117_v58 = vand.u32 2147483648, %v769_v20  ;;  %vm434_vm5 = vcmp.eq.s32.totalorder %v432_v53, 0 }
  0x72   :  { %v209_v16 = vor.u32 4788187, %v208_v12  ;;  %v212_v18 = vcvt.s32.f32 %v205_v10  ;;  %vm437_vm6 = vcmp.eq.s32.totalorder %v432_v53, 2  ;;  %vm116_vm7 = vcmp.eq.f32.partialorder %v769_v20, 0.0 }
  0x73   :  { %vm584_vm14 = vcmp.lt.s32.totalorder %v583_v15, 0  ;;  %vm121_vm8 = vcmp.eq.f32.partialorder %v773_v22, inf  ;;  %v124_v63 = vand.u32 2147483648, %v773_v22  ;;  %v326_v0 = vand.u32 3, %v322_v47 }
  0x74   :  { %v210_v59 = vand.u32 2147483647, %v209_v16  ;;  %v304_v25 = vsel %vm584_vm14, 0, %v583_v15  ;;  %vm433_vm10 = vcmp.lt.s32.totalorder %v432_v53, 2  ;;  %vm123_vm11 = vcmp.eq.f32.partialorder %v773_v22, 0.0 }
  0x75   :  { %v305_v19 = vsub.s32 32, %v304_v25  ;;  %v306_v26 = vshll.u32 %v297_v2, %v304_v25  ;;  %v309_v27 = vsub.s32 4294967266, %v304_v25  ;;  %vm541_vm14 = vcmp.eq.s32.totalorder %v536_v1, 2 }
  0x76   :  { %v213_v17 = vmul.f32 %v212_v18, %v210_v59 }
  0x77   :  { %v307_v55 = vshrl.u32 %v289_v21, %v305_v19  ;;  %v310_v30 = vadd.s32 127, %v309_v27 }
  0x78   :  { %v214_v24 = vxor.u32 2147483648, %v213_v17 }
  0x79   :  { %v308_v31 = vor.u32 %v307_v55, %v306_v26  ;;  %v311_v32 = vshll.u32 %v310_v30, 23  ;;  %v549_v55 = vld [vmem:[#allocation3 + $0x8] sm:$0xff] }
  0x7a   :  { %v215_v11 = vsel %vm132_vm13, %v214_v24, %v213_v17  ;;  %v614_v43 = vpop.eup %613  ;;  %vm331_vm13 = vcmp.eq.s32.totalorder %v326_v0, 2 }
  0x7b   :  { %v218_v29 = vsel %vm777_vm15, %v711_v48, %v215_v11  ;;  %v312_v35 = vor.u32 4788187, %v311_v32  ;;  %v315_v36 = vcvt.s32.f32 %v308_v31  ;;  %v616_v45 = vpop.eup %615  ;;  %v113_v54 = vmul.f32 %v614_v43, %v769_v20 }
  0x7c   :  { %617 = vcosq.f32 %v218_v29  ;;  %v120_v5 = vmul.f32 %v616_v45, %v773_v22  ;;  %vm327_vm15 = vcmp.lt.s32.totalorder %v326_v0, 2 }
  0x7d   :  { %619 = vsinq.f32 %v218_v29  ;;  %v313_v39 = vand.u32 2147483647, %v312_v35  ;;  %v115_v62 = vsel %vm114_vm2, %v769_v20, %v113_v54  ;;  %vm537_vm2 = vcmp.lt.s32.totalorder %v536_v1, 2  ;;  %v548_v29 = vld [vmem:[#allocation3] sm:$0xff] }
  0x7e   :  { %v118_v8 = vsel %vm116_vm7, %v117_v58, %v115_v62  ;;  %v122_v10 = vsel %vm121_vm8, %v773_v22, %v120_v5 }
  0x7f   :  { %v316_v40 = vmul.f32 %v315_v36, %v313_v39  ;;  %v125_v16 = vsel %vm123_vm11, %v124_v63, %v122_v10  ;;  %v126_v18 = vmul.f32 0.1, %v118_v8 }
  0x80   :  { %v127_v17 = vmul.f32 0.1, %v125_v16 }
  0x81   :  { %v317_v44 = vxor.u32 2147483648, %v316_v40 }
  0x83   :  { %v318_v46 = vsel %vm235_vm0, %v317_v44, %v316_v40  ;;  %vm328_vm0 = vcmp.eq.s32.totalorder %v326_v0, 0 }
  0x84   :  { %v321_v52 = vsel %vm234_vm1, %v713_v49, %v318_v46  ;;  %vm538_vm1 = vcmp.eq.s32.totalorder %v536_v1, 0 }
  0x85   :  { %621 = vcosq.f32 %v321_v52 }
  0x86   :  { %v618_v33 = vpop.eup %617  ;;  %623 = vsinq.f32 %v321_v52 }
  0x87   :  { %v620_v50 = vpop.eup %619  ;;  %v229_v61 = vxor.u32 2147483648, %v618_v33 }
  0x88   :  { %v226_v60 = vxor.u32 2147483648, %v620_v50 }
  0x89   :  { %v230_v3 = vsel %vm228_vm4, %v229_v61, %v620_v50  ;;  %v439_v6 = vsel %vm437_vm6, %v229_v61, %v620_v50 }
  0x8a   :  { %v227_v2 = vsel %vm225_vm3, %v618_v33, %v226_v60  ;;  %v436_v4 = vsel %vm434_vm5, %v618_v33, %v226_v60  ;;  %vm325_vm3 = vweird.f32 %v713_v49 }
  0x8b   :  { %v231_v12 = vsel %vm224_vm9, %v227_v2, %v230_v3  ;;  %v440_v13 = vsel %vm433_vm10, %v436_v4, %v439_v6 }
  0x8c   :  { %v232_v57 = vsel %vm222_vm12, nan, %v231_v12  ;;  %v441_v15 = vsel %vm222_vm12, nan, %v440_v13 }
  0x8d   :  { %v336_v24 = vmul.f32 %v232_v57, %v126_v18  ;;  %v546_v19 = vmul.f32 %v441_v15, %v126_v18 }
  0x8f   :  { %v622_v14 = vpop.eup %621 }
  0x90   :  { %v624_v7 = vpop.eup %623  ;;  %v332_v9 = vxor.u32 2147483648, %v622_v14 }
  0x91   :  { %v329_v59 = vxor.u32 2147483648, %v624_v7 }
  0x92   :  { %v333_v48 = vsel %vm331_vm13, %v332_v9, %v624_v7  ;;  %v543_v20 = vsel %vm541_vm14, %v332_v9, %v624_v7 }
  0x93   :  { %v330_v21 = vsel %vm328_vm0, %v622_v14, %v329_v59  ;;  %v540_v22 = vsel %vm538_vm1, %v622_v14, %v329_v59 }
  0x94   :  { %v334_v23 = vsel %vm327_vm15, %v330_v21, %v333_v48  ;;  %v544_v25 = vsel %vm537_vm2, %v540_v22, %v543_v20 }
  0x95   :  { %v335_v26 = vsel %vm325_vm3, nan, %v334_v23  ;;  %v545_v27 = vsel %vm325_vm3, nan, %v544_v25 }
  0x96   :  { %v337_v11 = vmul.f32 %v335_v26, %v127_v17  ;;  %v547_v28 = vmul.f32 %v545_v27, %v127_v17 }
  0x98   :  { %v554_v30 = vcombine.low %v336_v24, %v337_v11  ;;  %v555_v31 = vcombine.low %v546_v19, %v547_v28 }
  0x9a   :  { %v558_v32 = vadd.f32 %v554_v30, %v548_v29  ;;  %v559_v49 = vadd.f32 %v555_v31, %v549_v55 }
  0x9c   :  { %560 = vst [vmem:[#allocation6] sm:$0xff] %v558_v32  ;;  %561 = vst [vmem:[#allocation6 + $0x8] sm:$0xff] %v559_v49 }
  0x9d   :  { %658 = shalt.err (!%p655_p12)
}
  0x9e   :  { %s659_s9 = scalar_lea.hbm %s824_s2, 256 }
  0x9f   :  { %p660_p13 = scmp.ne.s32.totalorder %s824_s2, %s659_s9  ;;  %p663_p0 = scmp.lt.u32.totalorder %s659_s9, %s824_s2 }
  0xa1   :  { %p665_p1 = pnand %p663_p0, %p660_p13 }
  0xa3   :  { %668 = shalt.err (!%p665_p1)
}
  0xa4   :  { %571 = dma.vmem_to_hbm [thread:$0]  %s569_s5, 256, %s824_s2, [#allocation5]  }
  0xa5   :  { %671 = dma.done.wait [#allocation5], 256  }
  0xa6   :  { %672 = vsyncadd [#allocation5], 4294967040 }
  0xa7   :  { %575 = vsyncpa [#allocation4], 1 }
  0xa8   :  { %576 = vsyncpa [#allocation5], 1 }

</bundles_post_ra>
